<compile_context>
chip_gen: v6e
topology: v6e:2x2x1
jax: 0.10.0
libtpu: 0.0.40
codegen_flags: <defaults>
</compile_context>

<pallas_src>
import math

import jax
import jax.numpy as jnp
from jax.experimental import pallas as pl
from jax.experimental.pallas import tpu as pltpu


# ---------------------------------------------------------------------------
# Fused FusionLayer epilogue kernel
#   PyTorch:  out_i = way_i(x) * weights_i          (TrainableEltwiseLayer)
#             out_t = torch.stack(out_i, dim=1)
#             main_output = 0 + out_t + out_t       (added twice)
#   Kernel:   out[b, i, f] = 2 * x_i[b, f] * w[i, f]   in ONE HBM pass.
# ---------------------------------------------------------------------------
def _make_fused_kernel(n_ways):
    def kernel(*refs):
        x_refs = refs[:n_ways]
        w_ref = refs[n_ways]
        o_ref = refs[n_ways + 1]
        for i in range(n_ways):
            # (b_tile, f_tile) * (1, f_tile): sublane-broadcast multiply.
            # Native-dtype inputs; promotion happens here, cast on store.
            prod = x_refs[i][...] * w_ref[pl.ds(i, 1), :]
            res = (prod + prod).astype(o_ref.dtype)     # "+= out_t" twice == *2
            o_ref[:, pl.ds(i, 1), :] = res[:, None, :]
    return kernel


def _round_down(x, m):
    return max(m, (x // m) * m)


def _round_up(x, m):
    return ((x + m - 1) // m) * m


def _pad8(x):
    return _round_up(x, 8)


def _vmem_defaults():
    """Generation-aware budgets: v7x has 64 MiB VMEM + 2 TensorCores,
    v5e/v6e have 128 MiB VMEM + 1 TensorCore."""
    vmem_cap = None
    try:
        vmem_cap = int(pltpu.get_tpu_info().vmem_capacity_bytes)
    except Exception:
        vmem_cap = None
    if vmem_cap is not None and vmem_cap > 96 * 1024 * 1024:
        # v5e / v6e class: big VMEM, single TensorCore.
        return {"vmem_limit": 56 * 1024 * 1024,
                "vmem_target": 32 * 1024 * 1024,
                "min_f_steps": 1}
    # v7x class (or unknown): stay well under 64 MiB and guarantee >= 2
    # parallel grid steps so the second TensorCore is not idle.
    return {"vmem_limit": 40 * 1024 * 1024,
            "vmem_target": 24 * 1024 * 1024,
            "min_f_steps": 2}


def _pick_tiles(B, n_ways, F, itemsize, vmem_target, min_f_steps):
    """b_tile first, then the largest 128-multiple f_tile keeping the
    double-buffered footprint (n_ways x-blocks + out block + weight slab)
    under vmem_target."""
    b_tile = B if B <= 8 else 8

    # Padded VMEM elements per feature column, double buffered.
    per_f_elems = n_ways * _pad8(b_tile) + b_tile * _pad8(n_ways) + _pad8(n_ways)
    budget_f = max(128, vmem_target // (2 * itemsize * per_f_elems))

    if F <= budget_f:
        f_tile = F
        if B > 8:
            # Whole feature axis fits -> grow the batch tile instead.
            per_row_bytes = 2 * itemsize * F * (n_ways + _pad8(n_ways))
            rows = vmem_target // max(per_row_bytes, 1)
            if rows >= 16:
                b_tile = min(_round_down(B, 8), _round_down(int(rows), 8))
    else:
        f_tile = _round_down(min(F, budget_f), 128)

    # >= 2 grid steps along the (parallel) feature axis on 2-TC parts.
    if min_f_steps >= 2 and f_tile == F and F >= 256:
        f_tile = min(F, _round_up(-(-F // 2), 128))

    return b_tile, f_tile


def fused_fusion_stack_double(way_outputs, fusion_weights, *,
                              vmem_target_bytes=None, vmem_limit_bytes=None):
    """out[:, i] = 2 * way_outputs[i] * fusion_weights[i]  (single HBM pass).

    way_outputs:    list of n_ways arrays, each (B, nb_flow, H, W)
    fusion_weights: (n_ways, nb_flow, H, W)
    returns:        (B, n_ways, nb_flow, H, W)
    """
    n_ways = len(way_outputs)
    assert n_ways >= 1
    x0 = way_outputs[0]
    assert all(x.shape == x0.shape for x in way_outputs)
    B = x0.shape[0]
    feat_shape = tuple(x0.shape[1:])
    F = math.prod(feat_shape)
    assert fusion_weights.shape[0] == n_ways
    assert math.prod(fusion_weights.shape[1:]) == F

    out_dtype = jnp.result_type(fusion_weights.dtype,
                                *(x.dtype for x in way_outputs))
    # Native dtypes passed through; promotion/cast happens inside the kernel.
    xs2 = [x.reshape(B, F) for x in way_outputs]
    w2 = fusion_weights.reshape(n_ways, F)

    defaults = _vmem_defaults()
    vmem_limit = vmem_limit_bytes or defaults["vmem_limit"]
    vmem_target = vmem_target_bytes or defaults["vmem_target"]
    itemsize = jnp.dtype(out_dtype).itemsize
    b_tile, f_tile = _pick_tiles(B, n_ways, F, itemsize, vmem_target,
                                 defaults["min_f_steps"])

    # Batch axis innermost: the (n_ways, f_tile) weight slab keeps the same
    # block index across the inner loop, so its HBM traffic is paid once per
    # feature tile rather than once per batch tile.
    grid = (pl.cdiv(F, f_tile), pl.cdiv(B, b_tile))

    x_spec = pl.BlockSpec((b_tile, f_tile), lambda f, b: (b, f))
    w_spec = pl.BlockSpec((n_ways, f_tile), lambda f, b: (0, f))
    o_spec = pl.BlockSpec((b_tile, n_ways, f_tile), lambda f, b: (b, 0, f))

    out = pl.pallas_call(
        _make_fused_kernel(n_ways),
        out_shape=jax.ShapeDtypeStruct((B, n_ways, F), out_dtype),
        grid=grid,
        in_specs=[x_spec] * n_ways + [w_spec],
        out_specs=o_spec,
        compiler_params=pltpu.CompilerParams(
            dimension_semantics=("parallel", "parallel"),
            vmem_limit_bytes=vmem_limit,
        ),
    )(*xs2, w2)

    return out.reshape((B, n_ways) + feat_shape)


# ---------------------------------------------------------------------------
# Conv trunk (left to XLA) and full forward, mirroring stresnet_modified.
# ---------------------------------------------------------------------------
def _conv3x3(x, w, b):
    y = jax.lax.conv_general_dilated(
        x, w, window_strides=(1, 1), padding=((1, 1), (1, 1)),
        dimension_numbers=("NCHW", "OIHW", "NCHW"))
    return y + b[None, :, None, None]


def _residual_unit(x, p):
    out = _conv3x3(jax.nn.relu(x), p["c1_w"], p["c1_b"])      # _bn_relu_conv 1
    out = _conv3x3(jax.nn.relu(out), p["c2_w"], p["c2_b"])    # _bn_relu_conv 2
    return out + x


def _one_way_trunk(x, p):
    h = _conv3x3(x, p["conv1_w"], p["conv1_b"])
    for rp in p["res_units"]:
        h = _residual_unit(h, rp)
    h = jax.nn.relu(h)
    h = _conv3x3(h, p["conv2_w"], p["conv2_b"])
    return h                                                   # (B, nb_flow, H, W)


def stresnet_modified_forward(input_t, params, *, len_seq, nb_flow, H, W):
    x = input_t.reshape(-1, len_seq * nb_flow, H, W)
    way_feats = [_one_way_trunk(x, wp) for wp in params["ways"]]
    fusion_w = jnp.stack([wp["fusion_w"][0] for wp in params["ways"]], axis=0)
    # FusionLayer x6 + torch.stack + double accumulation fused in one kernel.
    return fused_fusion_stack_double(way_feats, fusion_w)


def stresnet_modified_reference(input_t, params, *, len_seq, nb_flow, H, W):
    x = input_t.reshape(-1, len_seq * nb_flow, H, W)
    outs = []
    for wp in params["ways"]:
        feat = _one_way_trunk(x, wp)
        outs.append(feat * wp["fusion_w"])        # TrainableEltwiseLayer
    out_t = jnp.stack(outs, axis=1)               # (B, n_ways, nb_flow, H, W)
    return out_t + out_t                          # main_output += out_t (twice)


def init_params(key, *, n_ways, in_channels, nb_flow, nb_filter, n_res_units, H, W):
    def conv_init(k, cout, cin):
        kw, kb = jax.random.split(k)
        w = jax.random.normal(kw, (cout, cin, 3, 3), jnp.float32) / jnp.sqrt(cin * 9.0)
        b = jax.random.normal(kb, (cout,), jnp.float32) * 0.01
        return w, b

    ways = []
    for i in range(n_ways):
        k = jax.random.fold_in(key, i)
        k1, k2, kf, kr = jax.random.split(k, 4)
        c1w, c1b = conv_init(k1, nb_filter, in_channels)
        c2w, c2b = conv_init(k2, nb_flow, nb_filter)
        res_units = []
        for r in range(n_res_units):
            kr1, kr2 = jax.random.split(jax.random.fold_in(kr, r))
            aw, ab = conv_init(kr1, nb_filter, nb_filter)
            bw, bb = conv_init(kr2, nb_filter, nb_filter)
            res_units.append({"c1_w": aw, "c1_b": ab, "c2_w": bw, "c2_b": bb})
        fusion_w = jax.random.normal(kf, (1, nb_flow, H, W), jnp.float32)
        ways.append({"conv1_w": c1w, "conv1_b": c1b, "res_units": res_units,
                     "conv2_w": c2w, "conv2_b": c2b, "fusion_w": fusion_w})
    return {"ways": ways}


# ---------------------------------------------------------------------------
# Checks
# ---------------------------------------------------------------------------
def _check_fused_epilogue(key, B, n_ways, nb_flow, H, W, x_dtype=jnp.float32,
                          w_dtype=jnp.float32, vmem_target_bytes=None):
    kx, kw = jax.random.split(key)
    xs = [jax.random.normal(jax.random.fold_in(kx, i), (B, nb_flow, H, W),
                            jnp.float32).astype(x_dtype) for i in range(n_ways)]
    w = jax.random.normal(kw, (n_ways, nb_flow, H, W), jnp.float32).astype(w_dtype)
    out = fused_fusion_stack_double(xs, w, vmem_target_bytes=vmem_target_bytes)
    jax.block_until_ready(out)
    stacked = jnp.stack([xs[i] * w[i] for i in range(n_ways)], axis=1)
    ref = stacked + stacked
    assert out.shape == (B, n_ways, nb_flow, H, W)
    assert out.dtype == ref.dtype
    assert jnp.allclose(out, ref, atol=1e-5, rtol=1e-5), "fused epilogue mismatch"


if __name__ == "__main__":
    root = jax.random.PRNGKey(0)

    # Scaled-down config consistent with stresnet_modified's t-branch:
    # t_conf = (len_seq=6, nb_flow=1, H, W), 6 parallel ways (small spatial /
    # filter / res-unit counts for the demo).
    B, LEN_SEQ, NB_FLOW, H, W = 2, 6, 1, 16, 16
    NB_FILTER, NB_RES_UNIT, N_WAYS = 16, 2, 6

    k_params, k_x, k_chk = jax.random.split(root, 3)
    params = init_params(k_params, n_ways=N_WAYS, in_channels=LEN_SEQ * NB_FLOW,
                         nb_flow=NB_FLOW, nb_filter=NB_FILTER,
                         n_res_units=NB_RES_UNIT, H=H, W=W)
    input_t = jax.random.normal(k_x, (B, LEN_SEQ, NB_FLOW, H, W), jnp.float32)

    fwd = jax.jit(lambda p, xt: stresnet_modified_forward(
        xt, p, len_seq=LEN_SEQ, nb_flow=NB_FLOW, H=H, W=W))
    ref_fwd = jax.jit(lambda p, xt: stresnet_modified_reference(
        xt, p, len_seq=LEN_SEQ, nb_flow=NB_FLOW, H=H, W=W))

    out = fwd(params, input_t)
    jax.block_until_ready(out)
    assert out.shape == (B, N_WAYS, NB_FLOW, H, W)
    ref = ref_fwd(params, input_t)
    assert jnp.allclose(out, ref, atol=1e-4, rtol=1e-4), "full forward mismatch"

    # Standalone fused-epilogue checks:
    # 1) real FusionLayer spatial shape (159x159, F not a multiple of 128).
    _check_fused_epilogue(jax.random.fold_in(k_chk, 0),
                          B=2, n_ways=6, nb_flow=1, H=159, W=159)
    # 2) bigger batch, mixed dtypes (in-kernel promotion), tiny VMEM target to
    #    exercise the multi-step tiled grid with partial trailing blocks.
    _check_fused_epilogue(jax.random.fold_in(k_chk, 1),
                          B=20, n_ways=6, nb_flow=1, H=16, W=16,
                          x_dtype=jnp.bfloat16,
                          vmem_target_bytes=192 * 1024)

    print("KERNEL_OK")
</pallas_src>

<mosaic_0001>
module attributes {stable_mosaic.version = 11 : i64} {
  func.func @kernel(%arg0: i32, %arg1: i32, %arg2: memref<2x128xf32, #tpu.memory_space<vmem>>, %arg3: memref<2x128xf32, #tpu.memory_space<vmem>>, %arg4: memref<2x128xf32, #tpu.memory_space<vmem>>, %arg5: memref<2x128xf32, #tpu.memory_space<vmem>>, %arg6: memref<2x128xf32, #tpu.memory_space<vmem>>, %arg7: memref<2x128xf32, #tpu.memory_space<vmem>>, %arg8: memref<6x128xf32, #tpu.memory_space<vmem>>, %arg9: memref<2x6x128xf32, #tpu.memory_space<vmem>>) attributes {dimension_semantics = [#tpu.dimension_semantics<parallel>, #tpu.dimension_semantics<parallel>], iteration_bounds = array<i64: 2, 1>, scalar_prefetch = 0 : i64, scratch_operands = 0 : i64, tpu.core_type = #tpu.core_type<tc>, window_params = [{transform_indices = @transform_0, window_bounds = array<i64: 2, 128>}, {transform_indices = @transform_1, window_bounds = array<i64: 2, 128>}, {transform_indices = @transform_2, window_bounds = array<i64: 2, 128>}, {transform_indices = @transform_3, window_bounds = array<i64: 2, 128>}, {transform_indices = @transform_4, window_bounds = array<i64: 2, 128>}, {transform_indices = @transform_5, window_bounds = array<i64: 2, 128>}, {transform_indices = @transform_6, window_bounds = array<i64: 6, 128>}, {transform_indices = @transform_7, window_bounds = array<i64: 2, 6, 128>}]} {
    %c0 = arith.constant 0 : index
    %c0_0 = arith.constant 0 : index
    %0 = vector.load %arg2[%c0, %c0_0] : memref<2x128xf32, #tpu.memory_space<vmem>>, vector<2x128xf32>
    %c0_1 = arith.constant 0 : index
    %c0_2 = arith.constant 0 : index
    %1 = vector.load %arg8[%c0_1, %c0_2] : memref<6x128xf32, #tpu.memory_space<vmem>>, vector<1x128xf32>
    %2 = vector.broadcast %1 : vector<1x128xf32> to vector<2x128xf32>
    %3 = arith.mulf %0, %2 : vector<2x128xf32>
    %4 = arith.addf %3, %3 : vector<2x128xf32>
    %5 = vector.shape_cast %4 : vector<2x128xf32> to vector<2x1x128xf32>
    %c0_3 = arith.constant 0 : index
    %c0_4 = arith.constant 0 : index
    %c0_5 = arith.constant 0 : index
    %6 = vector.load %arg9[%c0_3, %c0_4, %c0_5] : memref<2x6x128xf32, #tpu.memory_space<vmem>>, vector<2x1x128xf32>
    tpu.vector_store %arg9[%c0_3, %c0_4, %c0_5], %5 {strides = array<i32>} : memref<2x6x128xf32, #tpu.memory_space<vmem>>, vector<2x1x128xf32>,
    %c0_6 = arith.constant 0 : index
    %c0_7 = arith.constant 0 : index
    %7 = vector.load %arg3[%c0_6, %c0_7] : memref<2x128xf32, #tpu.memory_space<vmem>>, vector<2x128xf32>
    %c1 = arith.constant 1 : index
    %c0_8 = arith.constant 0 : index
    %8 = vector.load %arg8[%c1, %c0_8] : memref<6x128xf32, #tpu.memory_space<vmem>>, vector<1x128xf32>
    %9 = vector.broadcast %8 : vector<1x128xf32> to vector<2x128xf32>
    %10 = arith.mulf %7, %9 : vector<2x128xf32>
    %11 = arith.addf %10, %10 : vector<2x128xf32>
    %12 = vector.shape_cast %11 : vector<2x128xf32> to vector<2x1x128xf32>
    %c0_9 = arith.constant 0 : index
    %c1_10 = arith.constant 1 : index
    %c0_11 = arith.constant 0 : index
    %13 = vector.load %arg9[%c0_9, %c1_10, %c0_11] : memref<2x6x128xf32, #tpu.memory_space<vmem>>, vector<2x1x128xf32>
    tpu.vector_store %arg9[%c0_9, %c1_10, %c0_11], %12 {strides = array<i32>} : memref<2x6x128xf32, #tpu.memory_space<vmem>>, vector<2x1x128xf32>,
    %c0_12 = arith.constant 0 : index
    %c0_13 = arith.constant 0 : index
    %14 = vector.load %arg4[%c0_12, %c0_13] : memref<2x128xf32, #tpu.memory_space<vmem>>, vector<2x128xf32>
    %c2 = arith.constant 2 : index
    %c0_14 = arith.constant 0 : index
    %15 = vector.load %arg8[%c2, %c0_14] : memref<6x128xf32, #tpu.memory_space<vmem>>, vector<1x128xf32>
    %16 = vector.broadcast %15 : vector<1x128xf32> to vector<2x128xf32>
    %17 = arith.mulf %14, %16 : vector<2x128xf32>
    %18 = arith.addf %17, %17 : vector<2x128xf32>
    %19 = vector.shape_cast %18 : vector<2x128xf32> to vector<2x1x128xf32>
    %c0_15 = arith.constant 0 : index
    %c2_16 = arith.constant 2 : index
    %c0_17 = arith.constant 0 : index
    %20 = vector.load %arg9[%c0_15, %c2_16, %c0_17] : memref<2x6x128xf32, #tpu.memory_space<vmem>>, vector<2x1x128xf32>
    tpu.vector_store %arg9[%c0_15, %c2_16, %c0_17], %19 {strides = array<i32>} : memref<2x6x128xf32, #tpu.memory_space<vmem>>, vector<2x1x128xf32>,
    %c0_18 = arith.constant 0 : index
    %c0_19 = arith.constant 0 : index
    %21 = vector.load %arg5[%c0_18, %c0_19] : memref<2x128xf32, #tpu.memory_space<vmem>>, vector<2x128xf32>
    %c3 = arith.constant 3 : index
    %c0_20 = arith.constant 0 : index
    %22 = vector.load %arg8[%c3, %c0_20] : memref<6x128xf32, #tpu.memory_space<vmem>>, vector<1x128xf32>
    %23 = vector.broadcast %22 : vector<1x128xf32> to vector<2x128xf32>
    %24 = arith.mulf %21, %23 : vector<2x128xf32>
    %25 = arith.addf %24, %24 : vector<2x128xf32>
    %26 = vector.shape_cast %25 : vector<2x128xf32> to vector<2x1x128xf32>
    %c0_21 = arith.constant 0 : index
    %c3_22 = arith.constant 3 : index
    %c0_23 = arith.constant 0 : index
    %27 = vector.load %arg9[%c0_21, %c3_22, %c0_23] : memref<2x6x128xf32, #tpu.memory_space<vmem>>, vector<2x1x128xf32>
    tpu.vector_store %arg9[%c0_21, %c3_22, %c0_23], %26 {strides = array<i32>} : memref<2x6x128xf32, #tpu.memory_space<vmem>>, vector<2x1x128xf32>,
    %c0_24 = arith.constant 0 : index
    %c0_25 = arith.constant 0 : index
    %28 = vector.load %arg6[%c0_24, %c0_25] : memref<2x128xf32, #tpu.memory_space<vmem>>, vector<2x128xf32>
    %c4 = arith.constant 4 : index
    %c0_26 = arith.constant 0 : index
    %29 = vector.load %arg8[%c4, %c0_26] : memref<6x128xf32, #tpu.memory_space<vmem>>, vector<1x128xf32>
    %30 = vector.broadcast %29 : vector<1x128xf32> to vector<2x128xf32>
    %31 = arith.mulf %28, %30 : vector<2x128xf32>
    %32 = arith.addf %31, %31 : vector<2x128xf32>
    %33 = vector.shape_cast %32 : vector<2x128xf32> to vector<2x1x128xf32>
    %c0_27 = arith.constant 0 : index
    %c4_28 = arith.constant 4 : index
    %c0_29 = arith.constant 0 : index
    %34 = vector.load %arg9[%c0_27, %c4_28, %c0_29] : memref<2x6x128xf32, #tpu.memory_space<vmem>>, vector<2x1x128xf32>
    tpu.vector_store %arg9[%c0_27, %c4_28, %c0_29], %33 {strides = array<i32>} : memref<2x6x128xf32, #tpu.memory_space<vmem>>, vector<2x1x128xf32>,
    %c0_30 = arith.constant 0 : index
    %c0_31 = arith.constant 0 : index
    %35 = vector.load %arg7[%c0_30, %c0_31] : memref<2x128xf32, #tpu.memory_space<vmem>>, vector<2x128xf32>
    %c5 = arith.constant 5 : index
    %c0_32 = arith.constant 0 : index
    %36 = vector.load %arg8[%c5, %c0_32] : memref<6x128xf32, #tpu.memory_space<vmem>>, vector<1x128xf32>
    %37 = vector.broadcast %36 : vector<1x128xf32> to vector<2x128xf32>
    %38 = arith.mulf %35, %37 : vector<2x128xf32>
    %39 = arith.addf %38, %38 : vector<2x128xf32>
    %40 = vector.shape_cast %39 : vector<2x128xf32> to vector<2x1x128xf32>
    %c0_33 = arith.constant 0 : index
    %c5_34 = arith.constant 5 : index
    %c0_35 = arith.constant 0 : index
    %41 = vector.load %arg9[%c0_33, %c5_34, %c0_35] : memref<2x6x128xf32, #tpu.memory_space<vmem>>, vector<2x1x128xf32>
    tpu.vector_store %arg9[%c0_33, %c5_34, %c0_35], %40 {strides = array<i32>} : memref<2x6x128xf32, #tpu.memory_space<vmem>>, vector<2x1x128xf32>,
    return
  }
  func.func @transform_0(%arg0: i32, %arg1: i32) -> (i32, i32) {
    %c0_i32 = arith.constant 0 : i32
    return %arg1, %arg0 : i32, i32
  }
  func.func @transform_1(%arg0: i32, %arg1: i32) -> (i32, i32) {
    %c0_i32 = arith.constant 0 : i32
    return %arg1, %arg0 : i32, i32
  }
  func.func @transform_2(%arg0: i32, %arg1: i32) -> (i32, i32) {
    %c0_i32 = arith.constant 0 : i32
    return %arg1, %arg0 : i32, i32
  }
  func.func @transform_3(%arg0: i32, %arg1: i32) -> (i32, i32) {
    %c0_i32 = arith.constant 0 : i32
    return %arg1, %arg0 : i32, i32
  }
  func.func @transform_4(%arg0: i32, %arg1: i32) -> (i32, i32) {
    %c0_i32 = arith.constant 0 : i32
    return %arg1, %arg0 : i32, i32
  }
  func.func @transform_5(%arg0: i32, %arg1: i32) -> (i32, i32) {
    %c0_i32 = arith.constant 0 : i32
    return %arg1, %arg0 : i32, i32
  }
  func.func @transform_6(%arg0: i32, %arg1: i32) -> (i32, i32) {
    %c0_i32 = arith.constant 0 : i32
    %c0_i32_0 = arith.constant 0 : i32
    return %c0_i32, %arg0 : i32, i32
  }
  func.func @transform_7(%arg0: i32, %arg1: i32) -> (i32, i32, i32) {
    %c0_i32 = arith.constant 0 : i32
    %c0_i32_0 = arith.constant 0 : i32
    return %arg1, %c0_i32, %arg0 : i32, i32, i32
  }
}

</mosaic_0001>

<bundles_post_ra>
// kernel: _lambda_.1
= control target key start
LH: loop header
LB: loop body
LE: loop exit
PB: predicated region body
PF: predicated region fallthrough
CT: control target
= control target key end

     0   :  { %s1056_s24 = smov 0   ;;  %s1058_s25 = smov 0   ;;  %s1143_s0 = inlined_call_operand.vmem [shape: f32[2,256], index: 0, kind: input, shape index: {}]   ;;  %s1144_s1 = inlined_call_operand.vmem [shape: f32[2,256], index: 1, kind: input, shape index: {}]   ;;  %s1145_s2 = inlined_call_operand.vmem [shape: f32[2,256], index: 2, kind: input, shape index: {}]   ;;  %s1146_s3 = inlined_call_operand.vmem [shape: f32[2,256], index: 3, kind: input, shape index: {}]   ;;  %s1147_s4 = inlined_call_operand.vmem [shape: f32[2,256], index: 4, kind: input, shape index: {}]   ;;  %s1148_s5 = inlined_call_operand.vmem [shape: f32[2,256], index: 5, kind: input, shape index: {}]   ;;  %s1149_s6 = inlined_call_operand.vmem [shape: f32[6,256], index: 6, kind: input, shape index: {}]   ;;  %s1150_s7 = inlined_call_operand.vmem [shape: f32[2,6,256], index: 7, kind: output, shape index: {}]  }
   0x1   :  { %s1060_s26 = smov 0   ;;  %s1062_s27 = smov 0  }
   0x2   :  { %s1064_s28 = smov 0  }
   0x3 LB: > { %s899_s29 = sadd.s32 4294967295, %s1013_s28   ;;  %s29_s30 = sadd.s32 1, %s1009_s27  ;;  %s1013_s28 = sphi %s1064_s28, %s17_s28   ;;  %s1009_s27 = sphi %s1062_s27, %s1155_s27   ;;  %s1005_s26 = sphi %s1060_s26, %s1154_s26   ;;  %s1001_s25 = sphi %s1058_s25, %s1153_s25   ;;  %s997_s24 = sphi %s1056_s24, %s1152_s24  }
   0x4   : > { %p31_p0 = scmp.ge.s32.totalorder %s29_s30, 2  ;;  %s232_s8 = sadd.s32 1, %s1001_s25 }
   0x5   : > { %p242_p1 = scmp.ne.s32.totalorder %s1001_s25, %s997_s24  ;;  %p243_p2 = scmp.eq.s32.totalorder %s899_s29, 1 }
   0x6   : > { %s1157_s30 = smov (%p31_p0, %s29_s30), 0  ;;  %p903_p4 = scmp.ge.s32.totalorder %s1013_s28, 1 }
   0x7   : > { %p1085_p3 = por %p243_p2, %p242_p1  ;;  %s228_s10 = ssub.s32 %s1009_s27, %s1157_s30 }
   0x8   : > { %p340_p5 = scmp.lt.s32.totalorder %s1013_s28, 3  ;;  %p230_p6 = scmp.eq.s32.totalorder %s228_s10, 0 }
   0xa   : > { %p341_p7 = pnand %p903_p4, %p340_p5 }
   0xb   : > { %s1094_s11 = scalar_select %p230_p6, %s1001_s25, %s232_s8  }
   0xc   : > { %344 = sbr.rel (%p341_p7) target bundleno = 49 (0x31), region = 48  ;;  %p420_p8 = scmp.lt.s32.totalorder (!%p341_p7), %s1005_s26, 1 }
   0xd   : > { %s415_s12 = sand.u32 (!%p341_p7), 1, %s997_s24  }
   0xe   : > { %s1098_s14 = sshll.u32 (!%p341_p7), %s415_s12, 4 }
  0x11   : > { %v483_v0 = vlaneseq  ;;  %v1015_v1 = vmov 1966171168   ;;  %s421_s13 = scalar_select %p420_p8, %s1005_s26, 1 }
  0x12   : > { %v481_v2 = vunpack.c.l.s4 %v1015_v1 }
  0x13   : > { %v484_v4 = vshrl.u32 %v483_v0, 7  ;;  %s905_s15 = sshll.u32 %s421_s13, 1  ;;  %s911_s16 = sshll.u32 %s421_s13, 3 }
  0x14   : > { %v482_v3 = vunpack.c.0.s8 %v481_v2  ;;  %s425_s19 = scalar_lea.vmem %s1143_s0, %s905_s15  ;;  %s469_s22 = scalar_lea.vmem %s1149_s6, %s911_s16 }
  0x15   : > { %v471_v5 = vld [vmem:[%s425_s19] sm:$0x3]  ;;  %s433_s29 = scalar_lea.vmem %s1144_s1, %s905_s15  ;;  %s441_s12 = scalar_lea.vmem %s1145_s2, %s905_s15  ;;  %v918_v12 = vld [vmem:[%s469_s22 + $0x2] ss:$0 sm:$0xff]  ;;  %v921_v16 = vld [vmem:[%s469_s22 + $0x3] ss:$0 sm:$0xff] }
  0x16   : > { %v912_v6 = vld [vmem:[%s469_s22] ss:$0 sm:$0xff]  ;;  %v915_v7 = vld [vmem:[%s469_s22 + $0x1] ss:$0 sm:$0xff]  ;;  %v485_v9 = vsub.s32 %v482_v3, %v484_v4  ;;  %s449_s16 = scalar_lea.vmem %s1146_s3, %s905_s15  ;;  %s457_s20 = scalar_lea.vmem %s1147_s4, %s905_s15  ;;  %v924_v20 = vld [vmem:[%s469_s22 + $0x4] ss:$0 sm:$0xff] }
  0x17   : > { %v477_v8 = vmul.f32 %v912_v6, %v471_v5  ;;  %v506_v10 = vld [vmem:[%s433_s29] sm:$0x3]  ;;  %s465_s24 = scalar_lea.vmem %s1148_s5, %s905_s15  ;;  %v927_v22 = vld [vmem:[%s469_s22 + $0x5] ss:$0 sm:$0xff]  ;;  %s417_s29 = scalar_lea.vmem [#allocation2], %s1098_s14 }
  0x18   : > { %v541_v11 = vld [vmem:[%s441_s12] sm:$0x3]  ;;  %v512_v13 = vmul.f32 %v915_v7, %v506_v10  ;;  %s931_s14 = sshll.u32 (%p1085_p3), %s1005_s26, 3 }
  0x19   : > { %v547_v14 = vmul.f32 %v918_v12, %v541_v11  ;;  %v576_v15 = vld [vmem:[%s449_s16] sm:$0x3]  ;;  %v478_v18 = vadd.f32 %v477_v8, %v477_v8  ;;  %s692_s8 = scalar_lea.vmem (%p1085_p3), %s1150_s7, %s931_s14 }
  0x1a   : > { %v611_v17 = vld [vmem:[%s457_s20] sm:$0x3]  ;;  %v582_v19 = vmul.f32 %v921_v16, %v576_v15  ;;  %v513_v23 = vadd.f32 %v512_v13, %v512_v13 }
  0x1b   : > { %v646_v21 = vld [vmem:[%s465_s24] sm:$0x3]  ;;  %v548_v24 = vadd.f32 %v547_v14, %v547_v14  ;;  %v617_v25 = vmul.f32 %v924_v20, %v611_v17  ;;  %v486_v27 = vrot.slane %v478_v18, %v485_v9 }
  0x1c   : > { %v652_v26 = vmul.f32 %v927_v22, %v646_v21  ;;  %v583_v28 = vadd.f32 %v582_v19, %v582_v19  ;;  %v521_v29 = vrot.slane %v513_v23, %v485_v9 }
  0x1d   : > { %v556_v30 = vrot.slane %v548_v24, %v485_v9  ;;  %v618_v31 = vadd.f32 %v617_v25, %v617_v25  ;;  %913 = vst.sshfl [vmem:[%s417_s29] sm:$0x1 pattern:$0x73625140] %v486_v27  ;;  %v487_v33 = vcombine.high %v486_v27, %v486_v27 }
  0x1e   : > { %v653_v32 = vadd.f32 %v652_v26, %v652_v26  ;;  %v591_v34 = vrot.slane %v583_v28, %v485_v9  ;;  %916 = vst.sshfl [vmem:[%s417_s29 + $0x1] sm:$0x1 pattern:$0x73625140] %v521_v29  ;;  %v522_v35 = vcombine.high %v521_v29, %v521_v29 }
  0x1f   : > { %919 = vst.sshfl [vmem:[%s417_s29 + $0x2] sm:$0x1 pattern:$0x73625140] %v556_v30  ;;  %v557_v36 = vcombine.high %v556_v30, %v556_v30  ;;  %v626_v37 = vrot.slane %v618_v31, %v485_v9 }
  0x20   : > { %v661_v38 = vrot.slane %v653_v32, %v485_v9  ;;  %914 = vst.sshfl [vmem:[%s417_s29 + $0x8] sm:$0x1 pattern:$0x73625140] %v487_v33  ;;  %v592_v39 = vcombine.high %v591_v34, %v591_v34 }
  0x21   : > { %922 = vst.sshfl [vmem:[%s417_s29 + $0x3] sm:$0x1 pattern:$0x73625140] %v591_v34  ;;  %v627_v40 = vcombine.high %v626_v37, %v626_v37 }
  0x22   : > { %917 = vst.sshfl [vmem:[%s417_s29 + $0x9] sm:$0x1 pattern:$0x73625140] %v522_v35  ;;  %v662_v41 = vcombine.high %v661_v38, %v661_v38 }
  0x23   : > { %920 = vst.sshfl [vmem:[%s417_s29 + $0xa] sm:$0x1 pattern:$0x73625140] %v557_v36 }
  0x24   : > { %925 = vst.sshfl [vmem:[%s417_s29 + $0x4] sm:$0x1 pattern:$0x73625140] %v626_v37  ;;  %687 = sbr.rel (!%p1085_p3) target bundleno = 49 (0x31), region = 52 }
  0x25   : > { %928 = vst.sshfl [vmem:[%s417_s29 + $0x5] sm:$0x1 pattern:$0x73625140] %v661_v38 }
  0x26   : > { %923 = vst.sshfl [vmem:[%s417_s29 + $0xb] sm:$0x1 pattern:$0x73625140] %v592_v39 }
  0x27   : > { %926 = vst.sshfl [vmem:[%s417_s29 + $0xc] sm:$0x1 pattern:$0x73625140] %v627_v40 }
  0x28   : > { %929 = vst.sshfl [vmem:[%s417_s29 + $0xd] sm:$0x1 pattern:$0x73625140] %v662_v41 }
  0x2c   : > { %v723_v42 = vld [vmem:[%s417_s29] sm:$0xff] }
  0x2d   : > { %724 = vst [vmem:[%s692_s8] sm:$0xff] %v723_v42 }
  0x2f   : > { %v725_v43 = vld [vmem:[%s417_s29 + $0x8] sm:$0xff] }
  0x30   : > { %726 = vst [vmem:[%s692_s8 + $0x10] sm:$0xff] %v725_v43 }
  0x31 PF: > { %s17_s28 = sadd.s32 1, %s1013_s28   ;;  %s1152_s24 = smov %s1001_s25 }
  0x32   : > { %p14_p9 = scmp.ge.s32.totalorder %s17_s28, 4   ;;  %s1153_s25 = smov %s1094_s11 }
  0x33   : > { %s1154_s26 = smov %s1009_s27  ;;  %s1155_s27 = smov %s1157_s30 }
  0x34   :  { %16 = sbr.rel (!%p14_p9) target bundleno = 3 (0x3), region = 134 }

</bundles_post_ra>
